<compile_context>
chip_gen: v5e
topology: v5e:2x2
jax: 0.10.0
libtpu: 0.0.40
codegen_flags: <defaults>
</compile_context>

<pallas_src>
import jax
import jax.numpy as jnp
from jax.experimental import pallas as pl
from jax.experimental.pallas import tpu as pltpu


# ----------------------------- small helpers ------------------------------

_VMEM_LIMIT = 32 * 1024 * 1024   # explicit scoped-VMEM budget (safe on v5e/v6e/v7x)


def _round_up(x, m):
    return ((x + m - 1) // m) * m


def _pad_axis(x, axis, size):
    pad = size - x.shape[axis]
    if pad <= 0:
        return x
    widths = [(0, 0)] * x.ndim
    widths[axis] = (0, pad)
    return jnp.pad(x, widths)


# ----------------------------- Pallas kernels -----------------------------

def _make_matmul_stats_kernel():
    """Batched matmul with fused per-column sum / sum-of-squares reduction.

    Grid order is (j, g, i, k) with k innermost, so the (1, tn) stat blocks
    indexed only by j stay resident in VMEM while g/i/k accumulate into them.
    """
    def kernel(a_ref, b_ref, o_ref, sum_ref, sq_ref, acc_ref):
        g = pl.program_id(1)
        i = pl.program_id(2)
        k = pl.program_id(3)

        @pl.when(k == 0)
        def _():
            acc_ref[...] = jnp.zeros_like(acc_ref)

        @pl.when((g == 0) & (i == 0) & (k == 0))
        def _():
            sum_ref[...] = jnp.zeros_like(sum_ref)
            sq_ref[...] = jnp.zeros_like(sq_ref)

        acc_ref[...] += jnp.dot(a_ref[0, :, :], b_ref[0, :, :],
                                preferred_element_type=jnp.float32)

        @pl.when(k == pl.num_programs(3) - 1)
        def _():
            acc = acc_ref[...]
            o_ref[0, :, :] = acc.astype(o_ref.dtype)
            # Zero-padded rows / K columns contribute exactly 0 to the sums.
            sum_ref[...] += jnp.sum(acc, axis=0, keepdims=True)
            sq_ref[...] += jnp.sum(acc * acc, axis=0, keepdims=True)

    return kernel


def _make_matmul_kernel(activation):
    def kernel(a_ref, b_ref, o_ref, acc_ref):
        k = pl.program_id(3)

        @pl.when(k == 0)
        def _():
            acc_ref[...] = jnp.zeros_like(acc_ref)

        acc_ref[...] += jnp.dot(a_ref[0, :, :], b_ref[0, :, :],
                                preferred_element_type=jnp.float32)

        @pl.when(k == pl.num_programs(3) - 1)
        def _():
            out = acc_ref[...]
            if activation == "tanh":
                out = jnp.tanh(out)
            o_ref[0, :, :] = out.astype(o_ref.dtype)

    return kernel


def pallas_batched_matmul(a, b, activation=None, with_stats=False,
                          out_dtype=jnp.float32):
    """a: (G, M, K), b: (G, K, N) in bf16 -> (G, Mp, Np) in out_dtype.

    K/N-tiled MXU matmul with an f32 VMEM accumulator.  With `with_stats`,
    per-column sum and sum-of-squares (over all G groups and rows) are fused
    into the epilogue and returned as two (1, Np) arrays; otherwise an
    optional tanh epilogue can be fused.  Inputs are zero-padded to tile
    multiples; padded output rows/cols are exactly 0 (tanh(0)=0)."""
    G, M, K = a.shape
    Gb, Kb, N = b.shape
    assert G == Gb and K == Kb

    tm = min(1024, _round_up(M, 8))
    tk = min(512, _round_up(K, 128))
    tn = min(512, _round_up(N, 128))
    Mp, Kp, Np = _round_up(M, tm), _round_up(K, tk), _round_up(N, tn)

    a = _pad_axis(_pad_axis(a, 1, Mp), 2, Kp)
    b = _pad_axis(_pad_axis(b, 1, Kp), 2, Np)

    grid = (Np // tn, G, Mp // tm, Kp // tk)          # (j, g, i, k); k innermost
    a_spec = pl.BlockSpec((1, tm, tk), lambda j, g, i, k: (g, i, k))
    b_spec = pl.BlockSpec((1, tk, tn), lambda j, g, i, k: (g, k, j))
    o_spec = pl.BlockSpec((1, tm, tn), lambda j, g, i, k: (g, i, j))

    if with_stats:
        y, col_sum, col_sq = pl.pallas_call(
            _make_matmul_stats_kernel(),
            out_shape=(jax.ShapeDtypeStruct((G, Mp, Np), out_dtype),
                       jax.ShapeDtypeStruct((1, Np), jnp.float32),
                       jax.ShapeDtypeStruct((1, Np), jnp.float32)),
            grid=grid,
            in_specs=[a_spec, b_spec],
            out_specs=(o_spec,
                       pl.BlockSpec((1, tn), lambda j, g, i, k: (0, j)),
                       pl.BlockSpec((1, tn), lambda j, g, i, k: (0, j))),
            scratch_shapes=[pltpu.VMEM((tm, tn), jnp.float32)],
            compiler_params=pltpu.CompilerParams(
                # g/i must be sequential: the stat blocks accumulate across them.
                dimension_semantics=("parallel", "arbitrary", "arbitrary",
                                     "arbitrary"),
                vmem_limit_bytes=_VMEM_LIMIT),
        )(a, b)
        return y, col_sum, col_sq, (Mp, Np)

    out = pl.pallas_call(
        _make_matmul_kernel(activation),
        out_shape=jax.ShapeDtypeStruct((G, Mp, Np), out_dtype),
        grid=grid,
        in_specs=[a_spec, b_spec],
        out_specs=o_spec,
        scratch_shapes=[pltpu.VMEM((tm, tn), jnp.float32)],
        compiler_params=pltpu.CompilerParams(
            dimension_semantics=("parallel", "parallel", "parallel",
                                 "arbitrary"),
            vmem_limit_bytes=_VMEM_LIMIT),
    )(a, b)
    return out, (Mp, Np)


def _bn_scale_relu_kernel(y_ref, scale_ref, shift_ref, o_ref):
    o_ref[...] = jnp.maximum(
        y_ref[...] * scale_ref[...] + shift_ref[...], 0.0).astype(o_ref.dtype)


def pallas_bn_scale_relu(y, scale, shift, out_dtype=jnp.bfloat16):
    """out = relu(y * scale + shift), row-tiled, written in bf16."""
    R, C = y.shape
    tm = min(1024, _round_up(R, 8))
    Rp = _round_up(R, tm)
    yp = _pad_axis(y, 0, Rp)
    out = pl.pallas_call(
        _bn_scale_relu_kernel,
        out_shape=jax.ShapeDtypeStruct((Rp, C), out_dtype),
        grid=(Rp // tm,),
        in_specs=[
            pl.BlockSpec((tm, C), lambda i: (i, 0)),
            pl.BlockSpec((1, C), lambda i: (0, 0)),
            pl.BlockSpec((1, C), lambda i: (0, 0)),
        ],
        out_specs=pl.BlockSpec((tm, C), lambda i: (i, 0)),
        compiler_params=pltpu.CompilerParams(
            dimension_semantics=("parallel",),
            vmem_limit_bytes=_VMEM_LIMIT),
    )(yp, scale, shift)
    return out[:R] if Rp != R else out


def _bn_scale_shift(col_sum, col_sq, gamma, beta, real_rows, ncols, eps=1e-5):
    """Training-mode BatchNorm2d (biased variance) per-channel scale/shift
    from fused sum / sum-of-squares.  Tiny per-channel math in plain JAX."""
    mean = col_sum / real_rows
    var = jnp.maximum(col_sq / real_rows - mean * mean, 0.0)
    g = _pad_axis(gamma.reshape(1, -1).astype(jnp.float32), 1, ncols)
    b = _pad_axis(beta.reshape(1, -1).astype(jnp.float32), 1, ncols)
    scale = g * jax.lax.rsqrt(var + eps)
    shift = b - mean * scale
    return scale, shift


# ------------------- plain-JAX layout glue (NHWC, bf16) -------------------
# TODO(synk): the sub-pixel patch gather and pixel-shuffle interleave are
# layout glue in plain JAX; they could be moved in-kernel via manual DMA /
# in-VMEM shifted matmuls.

def _subpixel_patches(x):
    """x: (N, H, W, C) NHWC.  Patches for the 4 output-pixel parity classes of
    a stride-2 / k=4 / pad=1 ConvTranspose2d (no zero insertion, no zero taps).
    Returns (4, N*H*W, C*4), parity index p = (oy % 2) * 2 + (ox % 2)."""
    N, H, W, C = x.shape
    xp = jnp.pad(x, ((0, 0), (1, 1), (1, 1), (0, 0)))
    pats = []
    for a in (0, 1):
        for b in (0, 1):
            cols = [xp[:, a + dy:a + dy + H, b + dx:b + dx + W, :]
                    for dy in (0, 1) for dx in (0, 1)]
            p = jnp.stack(cols, axis=-1)                 # (N, H, W, C, 4)
            pats.append(p.reshape(N * H * W, C * 4))
    return jnp.stack(pats, axis=0)


def _subpixel_weights(w, cin_pad, cout_pad):
    """w: (Cin, Cout, 4, 4) -> (4, cin_pad*4, cout_pad) per-parity 2x2 matmul
    weights matching _subpixel_patches' column ordering (channel-major)."""
    wp = _pad_axis(_pad_axis(w, 0, cin_pad), 1, cout_pad)
    mats = []
    for a in (0, 1):
        for b in (0, 1):
            w_ab = wp[:, :, (3 - a)::-2, (3 - b)::-2]    # (cin_pad, cout_pad, 2, 2)
            mats.append(w_ab.transpose(0, 2, 3, 1).reshape(cin_pad * 4, cout_pad))
    return jnp.stack(mats, axis=0)


def _depth_to_space(y, n, h, w, c):
    """y: (4, n*h*w, c) parity-major -> (n, 2h, 2w, c) interleaved NHWC."""
    y = y.reshape(2, 2, n, h, w, c)
    y = y.transpose(2, 3, 0, 4, 1, 5)                    # (n, h, a, w, b, c)
    return y.reshape(n, 2 * h, 2 * w, c)


# ------------------------------ Generator ---------------------------------

def init_params(key, nz, ngf, nc):
    """DCGAN-style init (weights ~ N(0, 0.02), BN gamma=1, beta=0)."""
    chans = [(nz, ngf * 8), (ngf * 8, ngf * 4), (ngf * 4, ngf * 2),
             (ngf * 2, ngf), (ngf, nc)]
    ws, gammas, betas = [], [], []
    for i, (cin, cout) in enumerate(chans):
        key, sub = jax.random.split(key)
        ws.append(0.02 * jax.random.normal(sub, (cin, cout, 4, 4), jnp.float32))
        if i < len(chans) - 1:
            gammas.append(jnp.ones((cout,), jnp.float32))
            betas.append(jnp.zeros((cout,), jnp.float32))
    return {"w": ws, "gamma": gammas, "beta": betas}


def generator_forward(z, params):
    """Pallas forward.  z: (N, nz, 1, 1) NCHW -> (N, nc, 64, 64) NCHW."""
    ws = params["w"]
    n_layers = len(ws)
    n, nz = z.shape[0], z.shape[1]
    cpad = [_round_up(w.shape[1], 128) for w in ws]      # lane-dense channels

    # -- layer 0: ConvTranspose2d(nz, ngf*8, 4, 1, 0) on a 1x1 input == matmul
    cp0 = cpad[0]
    w0 = _pad_axis(ws[0], 1, cp0)                        # (nz, cp0, 4, 4)
    w0_mat = w0.transpose(0, 2, 3, 1).reshape(nz, 16 * cp0).astype(jnp.bfloat16)
    z_mat = z.reshape(n, nz).astype(jnp.bfloat16)
    y, s, sq, (mp, np_) = pallas_batched_matmul(z_mat[None], w0_mat[None],
                                                with_stats=True)
    y = y[0]
    if np_ != 16 * cp0:
        y, s, sq = y[:, :16 * cp0], s[:, :16 * cp0], sq[:, :16 * cp0]
    # Columns are (kh, kw, channel) channel-minor: fold the 16 spatial
    # positions into the per-channel BatchNorm statistics.
    s_c = s.reshape(16, cp0).sum(axis=0, keepdims=True)
    sq_c = sq.reshape(16, cp0).sum(axis=0, keepdims=True)
    scale, shift = _bn_scale_shift(s_c, sq_c, params["gamma"][0],
                                   params["beta"][0], real_rows=n * 16,
                                   ncols=cp0)
    slab = pallas_bn_scale_relu(y.reshape(mp * 16, cp0), scale, shift)
    x = slab[:n * 16].reshape(n, 4, 4, cp0)              # NHWC bf16, chan-padded

    # -- layers 1..4: stride-2 ConvTranspose2d via sub-pixel decomposition
    for li in range(1, n_layers):
        N_, H, W, cpi = x.shape
        cpo = cpad[li]
        is_last = li == n_layers - 1
        patches = _subpixel_patches(x)                   # (4, N*H*W, cpi*4) bf16
        w_stack = _subpixel_weights(ws[li], cpi, cpo).astype(jnp.bfloat16)
        m_real = N_ * H * W
        if is_last:
            y, (mp, np_) = pallas_batched_matmul(patches, w_stack,
                                                 activation="tanh")
        else:
            y, s, sq, (mp, np_) = pallas_batched_matmul(patches, w_stack,
                                                        with_stats=True)
            scale, shift = _bn_scale_shift(s, sq, params["gamma"][li],
                                           params["beta"][li],
                                           real_rows=4 * m_real, ncols=np_)
            slab = pallas_bn_scale_relu(y.reshape(4 * mp, np_), scale, shift)
            y = slab.reshape(4, mp, np_)
        y = y[:, :m_real, :cpo]
        x = _depth_to_space(y, N_, H, W, cpo)

    nc = ws[-1].shape[1]
    return x[..., :nc].transpose(0, 3, 1, 2).astype(jnp.float32)


# -------------------- pure-JAX reference (independent path) ---------------

def _zero_insert(x, s):
    if s == 1:
        return x
    n, c, h, w = x.shape
    up = jnp.zeros((n, c, (h - 1) * s + 1, (w - 1) * s + 1), x.dtype)
    return up.at[:, :, ::s, ::s].set(x)


def _im2col(x_pad, K, OH, OW):
    n, c, _, _ = x_pad.shape
    cols = []
    for kh in range(K):
        for kw in range(K):
            cols.append(x_pad[:, :, kh:kh + OH, kw:kw + OW])
    p = jnp.stack(cols, axis=0)            # (K*K, N, C, OH, OW)
    p = p.transpose(1, 3, 4, 2, 0)         # (N, OH, OW, C, K*K)
    return p.reshape(n * OH * OW, c * K * K)


def _conv_transpose_rows_ref(x, w, stride, pad):
    n, cin, h, wd = x.shape
    _, cout, K, _ = w.shape
    oh = (h - 1) * stride - 2 * pad + K
    ow = (wd - 1) * stride - 2 * pad + K
    x_up = _zero_insert(x, stride)
    pd = K - 1 - pad
    x_pad = jnp.pad(x_up, ((0, 0), (0, 0), (pd, pd), (pd, pd)))
    patches = _im2col(x_pad, K, oh, ow)
    w_mat = w[:, :, ::-1, ::-1].transpose(0, 2, 3, 1).reshape(cin * K * K, cout)
    y = jnp.dot(patches.astype(jnp.bfloat16), w_mat.astype(jnp.bfloat16),
                preferred_element_type=jnp.float32)
    return y, (n, oh, ow, cout)


def generator_forward_reference(z, params):
    """Plain-JAX reference using a different ConvTranspose2d lowering
    (zero-insert + flipped-kernel im2col), bf16-quantized matmuls to match."""
    x = z
    n_layers = len(params["w"])
    for li in range(n_layers):
        stride = 1 if li == 0 else 2
        pad = 0 if li == 0 else 1
        y, (n, oh, ow, cout) = _conv_transpose_rows_ref(
            x, params["w"][li], stride, pad)
        if li < n_layers - 1:
            g = params["gamma"][li].reshape(1, -1)
            b = params["beta"][li].reshape(1, -1)
            mean = jnp.mean(y, axis=0, keepdims=True)
            var = jnp.mean(y * y, axis=0, keepdims=True) - mean * mean
            y = jnp.maximum((y - mean) * jax.lax.rsqrt(var + 1e-5) * g + b, 0.0)
        else:
            y = jnp.tanh(y)
        x = y.reshape(n, oh, ow, cout).transpose(0, 3, 1, 2)
    return x


# TODO(synk): BatchNorm running_mean/running_var buffer updates are not
# emulated (they do not affect the forward output).

if __name__ == "__main__":
    nz, ngf, nc, batch = 8, 8, 3, 2
    key = jax.random.PRNGKey(0)
    kz, kp = jax.random.split(key)
    z = jax.random.normal(kz, (batch, nz, 1, 1), jnp.float32)
    params = init_params(kp, nz, ngf, nc)

    out = jax.block_until_ready(generator_forward(z, params))
    ref = jax.block_until_ready(generator_forward_reference(z, params))

    assert out.shape == (batch, nc, 64, 64), out.shape
    assert bool(jnp.all(jnp.isfinite(out)))
    max_err = float(jnp.max(jnp.abs(out - ref)))
    assert max_err < 5e-2, f"max abs err {max_err}"
    print("KERNEL_OK")
</pallas_src>

<mosaic_0001>
module attributes {stable_mosaic.version = 11 : i64} {
  func.func @kernel(%arg0: i32, %arg1: i32, %arg2: i32, %arg3: i32, %arg4: memref<1x8x128xbf16, #tpu.memory_space<vmem>>, %arg5: memref<1x128x512xbf16, #tpu.memory_space<vmem>>, %arg6: memref<1x8x512xf32, #tpu.memory_space<vmem>>, %arg7: memref<1x512xf32, #tpu.memory_space<vmem>>, %arg8: memref<1x512xf32, #tpu.memory_space<vmem>>, %arg9: memref<8x512xf32, #tpu.memory_space<vmem>>) attributes {dimension_semantics = [#tpu.dimension_semantics<parallel>, #tpu.dimension_semantics<arbitrary>, #tpu.dimension_semantics<arbitrary>, #tpu.dimension_semantics<arbitrary>], iteration_bounds = array<i64: 4, 1, 1, 1>, scalar_prefetch = 0 : i64, scratch_operands = 1 : i64, tpu.core_type = #tpu.core_type<tc>, window_params = [{transform_indices = @transform_0, window_bounds = array<i64: 1, 8, 128>}, {transform_indices = @transform_1, window_bounds = array<i64: 1, 128, 512>}, {transform_indices = @transform_2, window_bounds = array<i64: 1, 8, 512>}, {transform_indices = @transform_3, window_bounds = array<i64: 1, 512>}, {transform_indices = @transform_4, window_bounds = array<i64: 1, 512>}]} {
    %c0_i32 = arith.constant 0 : i32
    %0 = arith.cmpi eq, %arg3, %c0_i32 : i32
    %1 = arith.extui %0 : i1 to i32
    %c0_i32_0 = arith.constant 0 : i32
    %2 = arith.cmpi ne, %1, %c0_i32_0 : i32
    scf.if %2 {
      %cst_16 = arith.constant 0.000000e+00 : f32
      %21 = vector.broadcast %cst_16 : f32 to vector<8x512xf32>
      %c0_17 = arith.constant 0 : index
      %c0_18 = arith.constant 0 : index
      %22 = vector.load %arg9[%c0_17, %c0_18] : memref<8x512xf32, #tpu.memory_space<vmem>>, vector<8x512xf32>
      tpu.vector_store %arg9[%c0_17, %c0_18], %21 {strides = array<i32>} : memref<8x512xf32, #tpu.memory_space<vmem>>, vector<8x512xf32>,
    } else {
    }
    %c0_i32_1 = arith.constant 0 : i32
    %3 = arith.cmpi eq, %arg1, %c0_i32_1 : i32
    %c0_i32_2 = arith.constant 0 : i32
    %4 = arith.cmpi eq, %arg2, %c0_i32_2 : i32
    %5 = arith.andi %3, %4 : i1
    %c0_i32_3 = arith.constant 0 : i32
    %6 = arith.cmpi eq, %arg3, %c0_i32_3 : i32
    %7 = arith.andi %5, %6 : i1
    %8 = arith.extui %7 : i1 to i32
    %c0_i32_4 = arith.constant 0 : i32
    %9 = arith.cmpi ne, %8, %c0_i32_4 : i32
    scf.if %9 {
      %cst_16 = arith.constant 0.000000e+00 : f32
      %21 = vector.broadcast %cst_16 : f32 to vector<1x512xf32>
      %c0_17 = arith.constant 0 : index
      %c0_18 = arith.constant 0 : index
      %22 = vector.load %arg7[%c0_17, %c0_18] : memref<1x512xf32, #tpu.memory_space<vmem>>, vector<1x512xf32>
      tpu.vector_store %arg7[%c0_17, %c0_18], %21 {strides = array<i32>} : memref<1x512xf32, #tpu.memory_space<vmem>>, vector<1x512xf32>,
      %cst_19 = arith.constant 0.000000e+00 : f32
      %23 = vector.broadcast %cst_19 : f32 to vector<1x512xf32>
      %c0_20 = arith.constant 0 : index
      %c0_21 = arith.constant 0 : index
      %24 = vector.load %arg8[%c0_20, %c0_21] : memref<1x512xf32, #tpu.memory_space<vmem>>, vector<1x512xf32>
      tpu.vector_store %arg8[%c0_20, %c0_21], %23 {strides = array<i32>} : memref<1x512xf32, #tpu.memory_space<vmem>>, vector<1x512xf32>,
    } else {
    }
    %c0 = arith.constant 0 : index
    %c0_5 = arith.constant 0 : index
    %10 = vector.load %arg9[%c0, %c0_5] : memref<8x512xf32, #tpu.memory_space<vmem>>, vector<8x512xf32>
    %c0_6 = arith.constant 0 : index
    %c0_7 = arith.constant 0 : index
    %c0_8 = arith.constant 0 : index
    %11 = vector.load %arg4[%c0_6, %c0_7, %c0_8] : memref<1x8x128xbf16, #tpu.memory_space<vmem>>, vector<1x8x128xbf16>
    %12 = vector.shape_cast %11 : vector<1x8x128xbf16> to vector<8x128xbf16>
    %c0_9 = arith.constant 0 : index
    %c0_10 = arith.constant 0 : index
    %c0_11 = arith.constant 0 : index
    %13 = vector.load %arg5[%c0_9, %c0_10, %c0_11] : memref<1x128x512xbf16, #tpu.memory_space<vmem>>, vector<1x128x512xbf16>
    %14 = vector.shape_cast %13 : vector<1x128x512xbf16> to vector<128x512xbf16>
    %cst = arith.constant dense<0.000000e+00> : vector<8x512xf32>
    %15 = tpu.matmul %12, %14, %cst {dimension_numbers = #tpu.dot_dimension_numbers<[1], [0], [0], [1], [0, 0, 1, 1], [], []>} : vector<8x128xbf16>, vector<128x512xbf16>, vector<8x512xf32> -> vector<8x512xf32>
    %16 = arith.addf %10, %15 : vector<8x512xf32>
    %c0_12 = arith.constant 0 : index
    %c0_13 = arith.constant 0 : index
    %17 = vector.load %arg9[%c0_12, %c0_13] : memref<8x512xf32, #tpu.memory_space<vmem>>, vector<8x512xf32>
    tpu.vector_store %arg9[%c0_12, %c0_13], %16 {strides = array<i32>} : memref<8x512xf32, #tpu.memory_space<vmem>>, vector<8x512xf32>,
    %c0_i32_14 = arith.constant 0 : i32
    %18 = arith.cmpi eq, %arg3, %c0_i32_14 : i32
    %19 = arith.extui %18 : i1 to i32
    %c0_i32_15 = arith.constant 0 : i32
    %20 = arith.cmpi ne, %19, %c0_i32_15 : i32
    scf.if %20 {
      %c0_16 = arith.constant 0 : index
      %c0_17 = arith.constant 0 : index
      %21 = vector.load %arg9[%c0_16, %c0_17] : memref<8x512xf32, #tpu.memory_space<vmem>>, vector<8x512xf32>
      %c0_18 = arith.constant 0 : index
      %c0_19 = arith.constant 0 : index
      %c0_20 = arith.constant 0 : index
      %22 = vector.load %arg6[%c0_18, %c0_19, %c0_20] : memref<1x8x512xf32, #tpu.memory_space<vmem>>, vector<1x8x512xf32>
      %23 = vector.shape_cast %22 : vector<1x8x512xf32> to vector<8x512xf32>
      %24 = vector.shape_cast %21 : vector<8x512xf32> to vector<1x8x512xf32>
      tpu.vector_store %arg6[%c0_18, %c0_19, %c0_20], %24 {strides = array<i32>} : memref<1x8x512xf32, #tpu.memory_space<vmem>>, vector<1x8x512xf32>,
      %c0_21 = arith.constant 0 : index
      %c0_22 = arith.constant 0 : index
      %25 = vector.load %arg7[%c0_21, %c0_22] : memref<1x512xf32, #tpu.memory_space<vmem>>, vector<1x512xf32>
      %cst_23 = arith.constant dense<0.000000e+00> : vector<512xf32>
      %26 = vector.multi_reduction <add>, %21, %cst_23 [0] : vector<8x512xf32> to vector<512xf32>
      %27 = vector.shape_cast %26 : vector<512xf32> to vector<1x512xf32>
      %28 = arith.addf %25, %27 : vector<1x512xf32>
      %c0_24 = arith.constant 0 : index
      %c0_25 = arith.constant 0 : index
      %29 = vector.load %arg7[%c0_24, %c0_25] : memref<1x512xf32, #tpu.memory_space<vmem>>, vector<1x512xf32>
      tpu.vector_store %arg7[%c0_24, %c0_25], %28 {strides = array<i32>} : memref<1x512xf32, #tpu.memory_space<vmem>>, vector<1x512xf32>,
      %c0_26 = arith.constant 0 : index
      %c0_27 = arith.constant 0 : index
      %30 = vector.load %arg8[%c0_26, %c0_27] : memref<1x512xf32, #tpu.memory_space<vmem>>, vector<1x512xf32>
      %31 = arith.mulf %21, %21 : vector<8x512xf32>
      %cst_28 = arith.constant dense<0.000000e+00> : vector<512xf32>
      %32 = vector.multi_reduction <add>, %31, %cst_28 [0] : vector<8x512xf32> to vector<512xf32>
      %33 = vector.shape_cast %32 : vector<512xf32> to vector<1x512xf32>
      %34 = arith.addf %30, %33 : vector<1x512xf32>
      %c0_29 = arith.constant 0 : index
      %c0_30 = arith.constant 0 : index
      %35 = vector.load %arg8[%c0_29, %c0_30] : memref<1x512xf32, #tpu.memory_space<vmem>>, vector<1x512xf32>
      tpu.vector_store %arg8[%c0_29, %c0_30], %34 {strides = array<i32>} : memref<1x512xf32, #tpu.memory_space<vmem>>, vector<1x512xf32>,
    } else {
    }
    return
  }
  func.func @transform_0(%arg0: i32, %arg1: i32, %arg2: i32, %arg3: i32) -> (i32, i32, i32) {
    %c0_i32 = arith.constant 0 : i32
    return %arg1, %arg2, %arg3 : i32, i32, i32
  }
  func.func @transform_1(%arg0: i32, %arg1: i32, %arg2: i32, %arg3: i32) -> (i32, i32, i32) {
    %c0_i32 = arith.constant 0 : i32
    return %arg1, %arg3, %arg0 : i32, i32, i32
  }
  func.func @transform_2(%arg0: i32, %arg1: i32, %arg2: i32, %arg3: i32) -> (i32, i32, i32) {
    %c0_i32 = arith.constant 0 : i32
    return %arg1, %arg2, %arg0 : i32, i32, i32
  }
  func.func @transform_3(%arg0: i32, %arg1: i32, %arg2: i32, %arg3: i32) -> (i32, i32) {
    %c0_i32 = arith.constant 0 : i32
    %c0_i32_0 = arith.constant 0 : i32
    return %c0_i32, %arg0 : i32, i32
  }
  func.func @transform_4(%arg0: i32, %arg1: i32, %arg2: i32, %arg3: i32) -> (i32, i32) {
    %c0_i32 = arith.constant 0 : i32
    %c0_i32_0 = arith.constant 0 : i32
    return %c0_i32, %arg0 : i32, i32
  }
}

</mosaic_0001>

<bundles_post_ra>
// kernel: tpu_custom_call.1
= control target key start
LH: loop header
LB: loop body
LE: loop exit
PB: predicated region body
PF: predicated region fallthrough
CT: control target
= control target key end

     0   :  { %s1720_s0 = inlined_call_operand.hbm [shape: bf16[1,8,128], index: 0, kind: input, shape index: {}]   ;;  %s1721_s1 = inlined_call_operand.hbm [shape: bf16[1,128,2048], index: 1, kind: input, shape index: {}]   ;;  %s1722_s2 = inlined_call_operand.hbm [shape: f32[1,8,2048], index: 2, kind: output, shape index: {0}]   ;;  %s1723_s3 = inlined_call_operand.hbm [shape: f32[1,2048], index: 3, kind: output, shape index: {1}]   ;;  %s1724_s4 = inlined_call_operand.hbm [shape: f32[1,2048], index: 4, kind: output, shape index: {2}]  }
   0x1   :  { %1728 = sst [smem:[#allocation18_spill]] %s1720_s0 }
   0x2   :  { %10 = vsyncpa [#allocation4], 0 }
   0x3   :  { %11 = vsyncpa [#allocation7], 0 }
   0x4   :  { %13 = vsyncpa [#allocation7 + $0x1], 0 }
   0x5   :  { %14 = vsyncpa [#allocation5], 0 }
   0x6   :  { %16 = vsyncpa [#allocation5 + $0x1], 0 }
   0x7   :  { %17 = vsyncpa [#allocation10], 0 }
   0x8   :  { %19 = vsyncpa [#allocation10 + $0x1], 0  ;;  %s1427_s15 = smov 0   ;;  %s1429_s16 = smov 0  }
   0x9   :  { %s1431_s17 = smov 0   ;;  %s1433_s18 = smov 0  }
   0xa   :  { %s1435_s19 = smov 0   ;;  %s1437_s20 = smov 0  }
   0xb LB: > { %1729 = sst [smem:[#allocation16_spill]] %s1375_s15  ;;  %s1458_s21 = sadd.s32 4294967295, %s1395_s20   ;;  %s1395_s20 = sphi %s1437_s20, %s25_s20   ;;  %s1391_s19 = sphi %s1435_s19, %s1747_s19   ;;  %s1387_s18 = sphi %s1433_s18, %s1746_s18   ;;  %s1383_s17 = sphi %s1431_s17, %s1745_s17   ;;  %s1379_s16 = sphi %s1429_s16, %s1744_s16   ;;  %s1375_s15 = sphi %s1427_s15, %s1743_s15  }
   0xc   : > { %s1725_s22 = sadd.s32 4294967294, %s1395_s20   ;;  %s92_s23 = sadd.s32 1, %s1383_s17 }
   0xd   : > { %p99_p0 = scmp.ne.s32.totalorder %s1383_s17, %s1379_s16  ;;  %p100_p1 = scmp.eq.s32.totalorder %s1395_s20, 0 }
   0xe   : > { %p105_p2 = scmp.ne.s32.totalorder %s1379_s16, %s1375_s15  ;;  %p106_p3 = scmp.eq.s32.totalorder %s1458_s21, 0 }
   0xf   : > { %p133_p4 = scmp.eq.s32.totalorder %s1458_s21, 3  ;;  %p1469_p5 = por %p100_p1, %p99_p0 }
  0x10   : > { %p139_p6 = scmp.eq.s32.totalorder %s1725_s22, 3  ;;  %p1477_p7 = por %p106_p3, %p105_p2 }
  0x11   : > { %p1481_p8 = por %p133_p4, %p99_p0  ;;  %p919_p10 = scmp.ge.s32.totalorder %s1395_s20, 1 }
  0x12   : > { %p1485_p9 = por %p139_p6, %p105_p2  ;;  %p198_p11 = scmp.lt.s32.totalorder %s1395_s20, 5 }
  0x13   : > { %s1735_s0 = sld [smem:[#allocation18_spill]]  ;;  %s1397_s6 = smov [#allocation3]  }
  0x14   : > { %s1733_s27 = scalar_select %p1485_p9, 1, 0 }
  0x15   : > { %p1494_p12 = pnand %p919_p10, %p198_p11  ;;  %s216_s7 = sshll.u32 %s1397_s6, 4  ;;  %s217_s7 = int_to_ptr.vmem [resolvable:$true] %s216_s7 }
  0x16   : > { %1734 = sst [smem:[#allocation17_spill]] %s1733_s27  ;;  %p1133_p0 = scmp.lt.s32.totalorder %s1395_s20, 4 }
  0x17   : > { %p1114_p13 = pneg %p1494_p12  ;;  %s51_s9 = sadd.s32 1, %s1391_s19 }
  0x18   : > { %p1505_p2 = pnand %p1133_p0, %p1469_p5  ;;  %p53_p4 = scmp.ge.s32.totalorder %s51_s9, 4 }
  0x19   : > { %s214_s30 = sshll.u32 %s1735_s0, 4  ;;  %p1115_p1 = pnand %p1114_p13, %p106_p3  ;;  %s215_s30 = int_to_ptr.hbm [resolvable:$true] %s214_s30 }
  0x1a   : > { %s227_s10 = sand.u32 1, %s1383_s17   ;;  %s1749_s9 = smov (%p53_p4, %s51_s9), 0 }
  0x1b   : > { %1117 = dma.hbm_to_vmem [thread:$0]  (!%p1115_p1), %s215_s30, 64, %s217_s7, [#allocation4]  }
  0x1c   : > { %s922_s11 = sshll.u32 %s227_s10, 8  ;;  %s88_s12 = ssub.s32 %s1391_s19, %s1749_s9 }
  0x1d   : > { %p90_p6 = scmp.eq.s32.totalorder %s88_s12, 0  ;;  %s1068_s13 = sshll.u32 %s1391_s19, 4 }
  0x1e   : > { %s241_s24 = scalar_lea.hbm %s1721_s1, %s1068_s13  ;;  %s231_s29 = scalar_lea.vmem [#allocation6], %s922_s11 }
  0x1f   : > { %s244_s6 = sshll.u32 %s231_s29, 4  ;;  %s242_s0 = sshll.u32 %s241_s24, 4  ;;  %s245_s6 = int_to_ptr.vmem [resolvable:$true] %s244_s6  ;;  %s243_s0 = int_to_ptr.hbm [resolvable:$true] %s242_s0 }
  0x20   : > { %s1522_s22 = scalar_select %p90_p6, %s1383_s17, %s92_s23  }
  0x21   : > { %s228_s30 = scalar_lea.sflag [#allocation7], %s227_s10  ;;  %s1398_s7 = smov 1024  }
  0x22   : > { %s1399_s27 = smov 256   ;;  %s1400_s15 = smov 16  }
  0x23   : > { %1121 = dma.hbm_to_vmem [thread:$0]  (!%p1505_p2), %s243_s0, 4096, %s245_s6, %s228_s30, %s1398_s7, %s1399_s27, %s1400_s15  }
  0x24   : > { %256 = sbr.rel (%p1494_p12) target bundleno = 249 (0xf9), region = 28 }
  0x29   : > { %1358 = dma.done.wait (%p106_p3), [#allocation4], 64  }
  0x2a   : > { %1360 = vsyncadd (%p106_p3), [#allocation4], 4294967232  ;;  %s1533_s23 = sand.u32 1, %s1379_s16  }
  0x2b   : > { %s927_s10 = sshll.u32 %s1533_s23, 8  ;;  %s264_s11 = scalar_lea.sflag [#allocation7], %s1533_s23 }
  0x2c   : > { %s1537_s12 = scalar_lea.vmem [#allocation6], %s927_s10 }
  0x2d   : > { %1362 = dma.done.wait (%p1477_p7), %s264_s11, 4096  }
  0x2e   : > { %1364 = vsyncadd (%p1477_p7), %s264_s11, 4294963200  ;;  %v1045_v0 = vld [vmem:[%s1537_s12 + $0xe0] sm:$0xf]  ;;  %v1099_v1 = vld [vmem:[%s1537_s12 + $0xec] sm:$0xf0]  ;;  %s929_s0 = sshll.u32 %s1533_s23, 2 }
  0x2f   : > { %v1097_v2 = vld [vmem:[%s1537_s12 + $0xe4] sm:$0xf]  ;;  %v1046_v3 = vor.u32 %v1099_v1, %v1045_v0  ;;  %v1047_v4 = vld [vmem:[%s1537_s12 + $0xf0] sm:$0xf0]  ;;  %v1053_v5 = vld [vmem:[%s1537_s12 + $0xe8] sm:$0xf] }
  0x30   : > { %v1100_v6 = vld [vmem:[%s1537_s12 + $0xf4] sm:$0xf0]  ;;  %v1050_v7 = vor.u32 %v1097_v2, %v1047_v4  ;;  %v1098_v9 = vld [vmem:[%s1537_s12 + $0xec] sm:$0xf]  ;;  %v1055_v10 = vld [vmem:[%s1537_s12 + $0xf8] sm:$0xf0] }
  0x31   : > { %v1054_v8 = vor.u32 %v1100_v6, %v1053_v5  ;;  %v1029_v11 = vld [vmem:[%s1537_s12 + $0xc0] sm:$0xf]  ;;  %527 = vmatpush.bf16.msra.mxu0 %v1046_v3  ;;  %v1058_v12 = vor.u32 %v1098_v9, %v1055_v10  ;;  %v1095_v13 = vld [vmem:[%s1537_s12 + $0xcc] sm:$0xf0]  ;;  %v1093_v14 = vld [vmem:[%s1537_s12 + $0xc4] sm:$0xf] }
  0x32   : > { %v1031_v15 = vld [vmem:[%s1537_s12 + $0xd0] sm:$0xf0]  ;;  %540 = vmatpush.bf16.msra.mxu1 %v1050_v7  ;;  %v1030_v16 = vor.u32 %v1095_v13, %v1029_v11  ;;  %v1037_v18 = vld [vmem:[%s1537_s12 + $0xc8] sm:$0xf]  ;;  %v1096_v19 = vld [vmem:[%s1537_s12 + $0xd4] sm:$0xf0] }
  0x33   : > { %553 = vmatpush.bf16.msra.mxu2 %v1054_v8  ;;  %v1034_v17 = vor.u32 %v1093_v14, %v1031_v15  ;;  %v1094_v20 = vld [vmem:[%s1537_s12 + $0xcc] sm:$0xf]  ;;  %566 = vmatpush.bf16.msra.mxu3 %v1058_v12  ;;  %v1038_v21 = vor.u32 %v1096_v19, %v1037_v18  ;;  %v1039_v22 = vld [vmem:[%s1537_s12 + $0xd8] sm:$0xf0]  ;;  %v1013_v23 = vld [vmem:[%s1537_s12 + $0xa0] sm:$0xf] }
  0x34   : > { %v1091_v24 = vld [vmem:[%s1537_s12 + $0xac] sm:$0xf0]  ;;  %v1042_v25 = vor.u32 %v1094_v20, %v1039_v22  ;;  %v1089_v26 = vld [vmem:[%s1537_s12 + $0xa4] sm:$0xf]  ;;  %v1015_v27 = vld [vmem:[%s1537_s12 + $0xb0] sm:$0xf0] }
  0x35   : > { %v1021_v28 = vld [vmem:[%s1537_s12 + $0xa8] sm:$0xf]  ;;  %528 = vmatpush.bf16.msra.mxu0 %v1030_v16  ;;  %v1014_v29 = vor.u32 %v1091_v24, %v1013_v23  ;;  %v1092_v30 = vld [vmem:[%s1537_s12 + $0xb4] sm:$0xf0]  ;;  %v1090_v31 = vld [vmem:[%s1537_s12 + $0xac] sm:$0xf]  ;;  %v1018_v33 = vor.u32 %v1089_v26, %v1015_v27 }
  0x36   : > { %v1023_v32 = vld [vmem:[%s1537_s12 + $0xb8] sm:$0xf0]  ;;  %541 = vmatpush.bf16.msra.mxu1 %v1034_v17  ;;  %v1022_v34 = vor.u32 %v1092_v30, %v1021_v28  ;;  %v997_v35 = vld [vmem:[%s1537_s12 + $0x80] sm:$0xf]  ;;  %v1087_v36 = vld [vmem:[%s1537_s12 + $0x8c] sm:$0xf0] }
  0x37   : > { %554 = vmatpush.bf16.msra.mxu2 %v1038_v21  ;;  %v1085_v37 = vld [vmem:[%s1537_s12 + $0x84] sm:$0xf]  ;;  %567 = vmatpush.bf16.msra.mxu3 %v1042_v25  ;;  %v1026_v38 = vor.u32 %v1090_v31, %v1023_v32  ;;  %v999_v39 = vld [vmem:[%s1537_s12 + $0x90] sm:$0xf0]  ;;  %v1005_v40 = vld [vmem:[%s1537_s12 + $0x88] sm:$0xf]  ;;  %v998_v44 = vor.u32 %v1087_v36, %v997_v35 }
  0x38   : > { %v1088_v41 = vld [vmem:[%s1537_s12 + $0x94] sm:$0xf0]  ;;  %v1086_v42 = vld [vmem:[%s1537_s12 + $0x8c] sm:$0xf]  ;;  %v1007_v43 = vld [vmem:[%s1537_s12 + $0x98] sm:$0xf0]  ;;  %v1002_v45 = vor.u32 %v1085_v37, %v999_v39 }
  0x39   : > { %529 = vmatpush.bf16.msra.mxu0 %v1014_v29  ;;  %v1006_v46 = vor.u32 %v1088_v41, %v1005_v40  ;;  %v981_v47 = vld [vmem:[%s1537_s12 + $0x60] sm:$0xf]  ;;  %v1083_v48 = vld [vmem:[%s1537_s12 + $0x6c] sm:$0xf0]  ;;  %v1081_v49 = vld [vmem:[%s1537_s12 + $0x64] sm:$0xf]  ;;  %v1010_v50 = vor.u32 %v1086_v42, %v1007_v43 }
  0x3a   : > { %542 = vmatpush.bf16.msra.mxu1 %v1018_v33  ;;  %v983_v51 = vld [vmem:[%s1537_s12 + $0x70] sm:$0xf0]  ;;  %v989_v52 = vld [vmem:[%s1537_s12 + $0x68] sm:$0xf]  ;;  %v1084_v53 = vld [vmem:[%s1537_s12 + $0x74] sm:$0xf0]  ;;  %v982_v56 = vor.u32 %v1083_v48, %v981_v47  ;;  %v324_v33 = vlaneseq }
  0x3b   : > { %555 = vmatpush.bf16.msra.mxu2 %v1022_v34  ;;  %568 = vmatpush.bf16.msra.mxu3 %v1026_v38  ;;  %v1082_v54 = vld [vmem:[%s1537_s12 + $0x6c] sm:$0xf]  ;;  %v991_v55 = vld [vmem:[%s1537_s12 + $0x78] sm:$0xf0]  ;;  %v986_v57 = vor.u32 %v1081_v49, %v983_v51  ;;  %v990_v58 = vor.u32 %v1084_v53, %v989_v52  ;;  %v965_v59 = vld [vmem:[%s1537_s12 + $0x40] sm:$0xf] }
  0x3c   : > { %v1079_v60 = vld [vmem:[%s1537_s12 + $0x4c] sm:$0xf0]  ;;  %v1077_v61 = vld [vmem:[%s1537_s12 + $0x44] sm:$0xf]  ;;  %v994_v62 = vor.u32 %v1082_v54, %v991_v55  ;;  %v967_v63 = vld [vmem:[%s1537_s12 + $0x50] sm:$0xf0] }
  0x3d   : > { %530 = vmatpush.bf16.msra.mxu0 %v998_v44  ;;  %v973_v0 = vld [vmem:[%s1537_s12 + $0x48] sm:$0xf]  ;;  %v1080_v1 = vld [vmem:[%s1537_s12 + $0x54] sm:$0xf0]  ;;  %v1078_v2 = vld [vmem:[%s1537_s12 + $0x4c] sm:$0xf]  ;;  %v966_v4 = vor.u32 %v1079_v60, %v965_v59  ;;  %v970_v5 = vor.u32 %v1077_v61, %v967_v63 }
  0x3e   : > { %543 = vmatpush.bf16.msra.mxu1 %v1002_v45  ;;  %v975_v3 = vld [vmem:[%s1537_s12 + $0x58] sm:$0xf0]  ;;  %v974_v6 = vor.u32 %v1080_v1, %v973_v0  ;;  %v949_v7 = vld [vmem:[%s1537_s12 + $0x20] sm:$0xf]  ;;  %v1075_v8 = vld [vmem:[%s1537_s12 + $0x2c] sm:$0xf0] }
  0x3f   : > { %556 = vmatpush.bf16.msra.mxu2 %v1006_v46  ;;  %569 = vmatpush.bf16.msra.mxu3 %v1010_v50  ;;  %v1073_v9 = vld [vmem:[%s1537_s12 + $0x24] sm:$0xf]  ;;  %v978_v10 = vor.u32 %v1078_v2, %v975_v3  ;;  %v951_v11 = vld [vmem:[%s1537_s12 + $0x30] sm:$0xf0]  ;;  %v957_v12 = vld [vmem:[%s1537_s12 + $0x28] sm:$0xf]  ;;  %v950_v16 = vor.u32 %v1075_v8, %v949_v7 }
  0x40   : > { %v1076_v13 = vld [vmem:[%s1537_s12 + $0x34] sm:$0xf0]  ;;  %v1074_v14 = vld [vmem:[%s1537_s12 + $0x2c] sm:$0xf]  ;;  %v959_v15 = vld [vmem:[%s1537_s12 + $0x38] sm:$0xf0]  ;;  %v954_v17 = vor.u32 %v1073_v9, %v951_v11 }
  0x41   : > { %531 = vmatpush.bf16.msra.mxu0 %v982_v56  ;;  %v958_v18 = vor.u32 %v1076_v13, %v957_v12  ;;  %v933_v19 = vld [vmem:[%s1537_s12] sm:$0xf]  ;;  %v1071_v20 = vld [vmem:[%s1537_s12 + $0xc] sm:$0xf0]  ;;  %v1069_v21 = vld [vmem:[%s1537_s12 + $0x4] sm:$0xf]  ;;  %v962_v22 = vor.u32 %v1074_v14, %v959_v15 }
  0x42   : > { %544 = vmatpush.bf16.msra.mxu1 %v986_v57  ;;  %v935_v23 = vld [vmem:[%s1537_s12 + $0x10] sm:$0xf0]  ;;  %v941_v24 = vld [vmem:[%s1537_s12 + $0x8] sm:$0xf]  ;;  %v1072_v25 = vld [vmem:[%s1537_s12 + $0x14] sm:$0xf0]  ;;  %v934_v28 = vor.u32 %v1071_v20, %v933_v19 }
  0x43   : > { %557 = vmatpush.bf16.msra.mxu2 %v990_v58  ;;  %570 = vmatpush.bf16.msra.mxu3 %v994_v62  ;;  %v1070_v26 = vld [vmem:[%s1537_s12 + $0xc] sm:$0xf]  ;;  %v943_v27 = vld [vmem:[%s1537_s12 + $0x18] sm:$0xf0]  ;;  %v938_v29 = vor.u32 %v1069_v21, %v935_v23  ;;  %v942_v30 = vor.u32 %v1072_v25, %v941_v24  ;;  %vm1608_vm0 = vcmp.lt.s32.totalorder %v324_v33, 512  ;;  %s1612_s15 = scalar_lea.vmem [#allocation9], %s929_s0 }
  0x44   : > { %v946_v31 = vor.u32 %v1070_v26, %v943_v27  ;;  %v334_v32 = vld [vmem:[#allocation3] sm:$0xf]  ;;  %v1401_v35 = vmov 0.0   ;;  %s1617_s25 = scalar_lea.vmem [#allocation11], %s929_s0  ;;  %s928_s27 = sshll.u32 %s1533_s23, 5 }
  0x45   : > { %532 = vmatpush.bf16.msra.mxu0 %v966_v4  ;;  %328 = vst.msk [vmem:[%s1612_s15] sm:$0xf] %vm1608_vm0, %v1401_v35  ;;  %s1101_s5 = sshll.u32 %s1387_s18, 5  ;;  %s288_s8 = scalar_lea.vmem [#allocation8], %s928_s27 }
  0x46   : > { %545 = vmatpush.bf16.msra.mxu1 %v970_v5  ;;  %329 = vst.msk [vmem:[%s1617_s25] sm:$0xf] %vm1608_vm0, %v1401_v35  ;;  %s711_s28 = scalar_lea.hbm %s1722_s2, %s1101_s5  ;;  %s713_s24 = sshll.u32 %s288_s8, 4  ;;  %s1627_s24 = int_to_ptr.vmem [resolvable:$true] %s713_s24 }
  0x47   : > { %558 = vmatpush.bf16.msra.mxu2 %v974_v6  ;;  %571 = vmatpush.bf16.msra.mxu3 %v978_v10  ;;  %s715_s29 = sshll.u32 %s711_s28, 4  ;;  %s686_s6 = scalar_lea.sflag [#allocation5], %s1533_s23  ;;  %s1629_s29 = int_to_ptr.hbm [resolvable:$true] %s715_s29 }
  0x48   : > { %s1263_s30 = sshra.s32 %s1629_s29, 4  ;;  %s1269_s12 = scalar_lea.hbm %s1722_s2, 128  ;;  %s1264_s30 = int_to_ptr.hbm [resolvable:$true] %s1263_s30 }
  0x49   : > { %533 = vmatpush.bf16.msra.mxu0 %v950_v16  ;;  %s1265_s7 = scalar_lea.hbm %s1264_s30, 32  ;;  %p1270_p10 = scmp.lt.s32.totalorder %s1264_s30, %s1722_s2 }
  0x4a   : > { %546 = vmatpush.bf16.msra.mxu1 %v954_v17  ;;  %p1266_p3 = scmp.ne.s32.totalorder %s1264_s30, %s1265_s7  ;;  %p1271_p11 = scmp.lt.s32.totalorder %s1269_s12, %s1265_s7 }
  0x4b   : > { %559 = vmatpush.bf16.msra.mxu2 %v958_v18  ;;  %572 = vmatpush.bf16.msra.mxu3 %v962_v22 }
  0x4c   : > { %p1267_p5 = pnand %p1266_p3, %p1481_p8  ;;  %p1272_p12 = por %p1271_p11, %p1270_p10 }
  0x4d   : > { %534 = vmatpush.bf16.msra.mxu0 %v934_v28 }
  0x4e   : > { %547 = vmatpush.bf16.msra.mxu1 %v938_v29  ;;  %p1268_p7 = pneg %p1267_p5 }
  0x4f   : > { %560 = vmatpush.bf16.msra.mxu2 %v942_v30  ;;  %573 = vmatpush.bf16.msra.mxu3 %v946_v31 }
  0x50   : > { %535 = vmatmul.bf16.vlgmr.msra.gmra.mxu0 %v334_v32  ;;  %p1273_p13 = pnand %p1272_p12, %p1268_p7 }
  0x51   : > { %548 = vmatmul.bf16.vlgmr.msra.gmra.mxu1 %v334_v32 }
  0x52   : > { %561 = vmatmul.bf16.vlgmr.msra.gmra.mxu2 %v334_v32  ;;  %574 = vmatmul.bf16.vlgmr.msra.gmra.mxu3 %v334_v32 }
  0xcd   : > { %v536_v36 = vpop.f32.mrf.mxu0 }
  0xce   : > { %594 = vst [vmem:[%s288_s8] sm:$0xff] %v536_v36  ;;  %v599_v37 = vrot.slane %v536_v36, 4  ;;  %v644_v38 = vmul.f32 %v536_v36, %v536_v36  ;;  %v549_v39 = vpop.f32.mrf.mxu1 }
  0xcf   : > { %595 = vst [vmem:[%s288_s8 + $0x8] sm:$0xff] %v549_v39  ;;  %v605_v40 = vrot.slane %v549_v39, 4  ;;  %v645_v41 = vmul.f32 %v549_v39, %v549_v39 }
  0xd0   : > { %v600_v42 = vadd.f32 %v599_v37, %v536_v36  ;;  %v648_v43 = vrot.slane %v644_v38, 4 }
  0xd1   : > { %v606_v44 = vadd.f32 %v605_v40, %v549_v39  ;;  %v654_v45 = vrot.slane %v645_v41, 4 }
  0xd2   : > { %v649_v46 = vadd.f32 %v648_v43, %v644_v38  ;;  %v601_v49 = vrot.slane %v600_v42, 2 }
  0xd3   : > { %v607_v47 = vrot.slane %v606_v44, 2  ;;  %v655_v48 = vadd.f32 %v654_v45, %v645_v41 }
  0xd4   : > { %v650_v57 = vrot.slane %v649_v46, 2 }
  0xd5   : > { %v562_v50 = vpop.f32.mrf.mxu2  ;;  %v608_v51 = vadd.f32 %v607_v47, %v606_v44  ;;  %v656_v52 = vrot.slane %v655_v48, 2  ;;  %v575_v55 = vpop.f32.mrf.mxu3 }
  0xd6   : > { %596 = vst [vmem:[%s288_s8 + $0x10] sm:$0xff] %v562_v50  ;;  %v611_v53 = vrot.slane %v562_v50, 4  ;;  %v646_v54 = vmul.f32 %v562_v50, %v562_v50  ;;  %v538_v56 = vpop.f32.mrf.mxu0  ;;  %v617_v58 = vrot.slane %v575_v55, 4  ;;  %v647_v59 = vmul.f32 %v575_v55, %v575_v55  ;;  %v551_v60 = vpop.f32.mrf.mxu1 }
  0xd7   : > { %597 = vst [vmem:[%s288_s8 + $0x18] sm:$0xff] %v575_v55  ;;  %v657_v61 = vadd.f32 %v656_v52, %v655_v48 }
  0xd8   : > { %v612_v62 = vadd.f32 %v611_v53, %v562_v50  ;;  %v660_v63 = vrot.slane %v646_v54, 4 }
  0xd9   : > { %1276 = shalt.err (!%p1273_p13)
}
  0xda   : > { %1108 = dma.vmem_to_hbm [thread:$0]  (%p1481_p8), %s1627_s24, 512, %s1629_s29, %s686_s6   ;;  %v602_v0 = vadd.f32 %v601_v49, %v600_v42  ;;  %v609_v1 = vrot.slane %v608_v51, 1  ;;  %v618_v2 = vadd.f32 %v617_v58, %v575_v55  ;;  %v666_v3 = vrot.slane %v647_v59, 4  ;;  %v598_v38 = vld [vmem:[%s1612_s15] sm:$0xf] }
  0xdb   : > { %v613_v4 = vrot.slane %v612_v62, 2  ;;  %v661_v5 = vadd.f32 %v660_v63, %v646_v54  ;;  %v651_v6 = vadd.f32 %v650_v57, %v649_v46  ;;  %v658_v7 = vrot.slane %v657_v61, 1  ;;  %s1064_s23 = sshll.u32 %s1387_s18, 2  ;;  %s690_s18 = sand.u32 1, %s1458_s21   ;;  %v643_v43 = vld [vmem:[%s1617_s25] sm:$0xf] }
  0xdc   : > { %v619_v8 = vrot.slane %v618_v2, 2  ;;  %v667_v9 = vadd.f32 %v666_v3, %v647_v59  ;;  %v603_v12 = vrot.slane %v602_v0, 1  ;;  %v610_v13 = vadd.f32 %v609_v1, %v608_v51  ;;  %s725_s13 = scalar_lea.hbm %s1723_s3, %s1064_s23  ;;  %s739_s24 = scalar_lea.hbm %s1724_s4, %s1064_s23 }
  0xdd   : > { %v614_v10 = vadd.f32 %v613_v4, %v612_v62  ;;  %v662_v11 = vrot.slane %v661_v5, 2  ;;  %v564_v16 = vpop.f32.mrf.mxu2  ;;  %v577_v19 = vpop.f32.mrf.mxu3  ;;  %v652_v20 = vrot.slane %v651_v6, 1  ;;  %v659_v21 = vadd.f32 %v658_v7, %v657_v61  ;;  %s727_s29 = sshll.u32 %s1612_s15, 4  ;;  %s729_s6 = sshll.u32 %s725_s13, 4  ;;  %s728_s29 = int_to_ptr.vmem [resolvable:$true] %s727_s29  ;;  %s730_s6 = int_to_ptr.hbm [resolvable:$true] %s729_s6 }
  0xde   : > { %v620_v14 = vadd.f32 %v619_v8, %v618_v2  ;;  %v668_v15 = vrot.slane %v667_v9, 2  ;;  %vm630_vm1 = vcmask 1040384   ;;  %v604_v26 = vadd.f32 %v603_v12, %v602_v0  ;;  %s743_s21 = sshll.u32 %s739_s24, 4  ;;  %s741_s30 = sshll.u32 %s1617_s25, 4  ;;  %s1666_s30 = int_to_ptr.vmem [resolvable:$true] %s741_s30  ;;  %s1668_s21 = int_to_ptr.hbm [resolvable:$true] %s743_s21 }
  0xdf   : > { %v615_v17 = vrot.slane %v614_v10, 1  ;;  %v663_v18 = vadd.f32 %v662_v11, %v661_v5  ;;  %v627_v27 = vrot.slane %v610_v13, 7  ;;  %vm632_vm2 = vcmask 1042434   ;;  %s691_s7 = scalar_lea.sflag [#allocation10], %s690_s18  ;;  %s1291_s10 = sshra.s32 %s730_s6, 4  ;;  %s1292_s10 = int_to_ptr.hbm [resolvable:$true] %s1291_s10 }
  0xe0   : > { %v621_v22 = vrot.slane %v620_v14, 1  ;;  %v669_v23 = vadd.f32 %v668_v15, %v667_v9  ;;  %vm634_vm3 = vcmask 1041408   ;;  %v653_v32 = vadd.f32 %v652_v20, %v651_v6  ;;  %s1293_s11 = scalar_lea.hbm %s1292_s10, 4  ;;  %s1297_s27 = scalar_lea.hbm %s1723_s3, 16 }
  0xe1   : > { %v616_v24 = vadd.f32 %v615_v17, %v614_v10  ;;  %v664_v25 = vrot.slane %v663_v18, 1  ;;  %v676_v33 = vrot.slane %v659_v21, 7  ;;  %v631_v39 = vsel %vm630_vm1, %v604_v26, %v627_v27  ;;  %p1294_p0 = scmp.ne.s32.totalorder %s1292_s10, %s1293_s11  ;;  %p1298_p4 = scmp.lt.s32.totalorder %s1292_s10, %s1723_s3 }
  0xe2   : > { %v622_v28 = vadd.f32 %v621_v22, %v620_v14  ;;  %v670_v29 = vrot.slane %v669_v23, 1  ;;  %p1299_p6 = scmp.lt.s32.totalorder %s1297_s27, %s1293_s11 }
  0xe3   : > { %v628_v30 = vrot.slane %v616_v24, 6  ;;  %v665_v31 = vadd.f32 %v664_v25, %v663_v18  ;;  %v679_v44 = vsel %vm630_vm1, %v653_v32, %v676_v33  ;;  %p1295_p1 = pnand %p1294_p0, %p1481_p8 }
  0xe4   : > { %v629_v35 = vrot.slane %v622_v28, 5  ;;  %v671_v36 = vadd.f32 %v670_v29, %v669_v23  ;;  %p1300_p3 = por %p1299_p6, %p1298_p4 }
  0xe5   : > { %v677_v37 = vrot.slane %v665_v31, 6  ;;  %p1296_p2 = pneg %p1295_p1 }
  0xe6   : > { %v633_v40 = vsel %vm632_vm2, %v628_v30, %v629_v35  ;;  %v678_v41 = vrot.slane %v671_v36, 5 }
  0xe7   : > { %v635_v42 = vsel %vm634_vm3, %v631_v39, %v633_v40  ;;  %p1301_p5 = pnand %p1300_p3, %p1296_p2 }
  0xe8   : > { %v680_v45 = vsel %vm632_vm2, %v677_v37, %v678_v41  ;;  %v637_v46 = vadd.f32 %v635_v42, %v598_v38 }
  0xe9   : > { %v681_v47 = vsel %vm634_vm3, %v679_v44, %v680_v45 }
  0xea   : > { %642 = vst.msk [vmem:[%s1612_s15] sm:$0xf] %vm1608_vm0, %v637_v46  ;;  %v683_v48 = vadd.f32 %v681_v47, %v643_v43 }
  0xeb   : > { %1304 = shalt.err (!%p1301_p5)
}
  0xec   : > { %1109 = dma.vmem_to_hbm [thread:$0]  (%p1481_p8), %s728_s29, 64, %s730_s6, %s691_s7   ;;  %684 = vst.msk [vmem:[%s1617_s25] sm:$0xf] %vm1608_vm0, %v683_v48 }
  0xed   : > { %s1319_s15 = sshra.s32 %s1668_s21, 4  ;;  %s1325_s14 = scalar_lea.hbm %s1724_s4, 16  ;;  %s1320_s15 = int_to_ptr.hbm [resolvable:$true] %s1319_s15 }
  0xee   : > { %s1321_s8 = scalar_lea.hbm %s1320_s15, 4  ;;  %p1326_p12 = scmp.lt.s32.totalorder %s1320_s15, %s1724_s4 }
  0xef   : > { %p1322_p7 = scmp.ne.s32.totalorder %s1320_s15, %s1321_s8  ;;  %p1327_p13 = scmp.lt.s32.totalorder %s1325_s14, %s1321_s8 }
  0xf1   : > { %p1323_p10 = pnand %p1322_p7, %p1481_p8  ;;  %p1328_p0 = por %p1327_p13, %p1326_p12 }
  0xf3   : > { %p1324_p11 = pneg %p1323_p10 }
  0xf5   : > { %p1329_p1 = pnand %p1328_p0, %p1324_p11 }
  0xf7   : > { %1332 = shalt.err (!%p1329_p1)
}
  0xf8   : > { %1110 = dma.vmem_to_hbm [thread:$0]  (%p1481_p8), %s1666_s30, 64, %s1668_s21, %s691_s7  }
  0xf9 PF: > { %s1740_s25 = sld [smem:[#allocation16_spill]]  ;;  %p1135_p2 = scmp.ge.s32.totalorder %s1395_s20, 2 }
  0xfb   : > { %p1123_p4 = pnand %p1135_p2, %p1485_p9 }
  0xfd   : > { %p1124_p6 = pneg %p1123_p4 }
  0xff   : > { %s755_s6 = sand.u32 1, %s1740_s25  }
 0x100   : > { %s756_s10 = scalar_lea.sflag [#allocation5], %s755_s6 }
 0x101   : > { %1366 = dma.done.wait (%p1124_p6), %s756_s10, 512  }
 0x102   : > { %1368 = vsyncadd (%p1124_p6), %s756_s10, 4294966784  ;;  %s1742_s11 = sadd.s32 4294967294, %s1395_s20  }
 0x103   : > { %s765_s12 = sand.u32 1, %s1742_s11  }
 0x104   : > { %s766_s0 = scalar_lea.sflag [#allocation10], %s765_s12 }
 0x105   : > { %1370 = dma.done.wait (%p1124_p6), %s766_s0, 128  }
 0x106   : > { %1372 = vsyncadd (%p1124_p6), %s766_s0, 4294967168  ;;  %s25_s20 = sadd.s32 1, %s1395_s20   ;;  %s1743_s15 = smov %s1379_s16 }
 0x107   : > { %p22_p8 = scmp.ge.s32.totalorder %s25_s20, 6   ;;  %s1744_s16 = smov %s1383_s17 }
 0x108   : > { %s1745_s17 = smov %s1522_s22  ;;  %s1746_s18 = smov %s1391_s19 }
 0x109   : > { %s1747_s19 = smov %s1749_s9  ;;  %24 = sbr.rel (!%p22_p8) target bundleno = 11 (0xb), region = 123 }
 0x10e   :  { %782 = vsyncpa [#allocation4], 1 }
 0x10f   :  { %784 = vsyncpa [#allocation4 + $0x1], 1 }
 0x110   :  { %785 = vsyncpa [#allocation7], 1 }
 0x111   :  { %787 = vsyncpa [#allocation7 + $0x1], 1 }
 0x112   :  { %788 = vsyncpa [#allocation5], 1 }
 0x113   :  { %790 = vsyncpa [#allocation5 + $0x1], 1 }
 0x114   :  { %791 = vsyncpa [#allocation10], 1 }
 0x115   :  { %793 = vsyncpa [#allocation10 + $0x1], 1 }

</bundles_post_ra>
